<compile_context>
chip_gen: v6e
topology: v6e:2x2x1
jax: 0.10.0
libtpu: 0.0.40
codegen_flags: <defaults>
</compile_context>

<pallas_src>
import jax
import jax.numpy as jnp
from jax import lax
from jax.experimental import pallas as pl
from jax.experimental.pallas import tpu as pltpu


def gcn_res_fused_kernel(a_ref, x_ref, wt_ref, b_ref, o_ref, dsum_ref, diag_ref):
    """Fused GCN normalization + linear + per-row scale + residual.

    Grid: (row tiles, A-column tiles).  Per row tile, column tiles accumulate
    rowsum(I+A) and diag(I+A); the last column tile finalizes the output tile.
    """
    k = pl.program_id(1)
    nk = pl.num_programs(1)
    tm, tk = a_ref.shape                      # static block dims
    row0 = pl.program_id(0) * tm              # global row offset of this tile
    col0 = k * tk                             # global col offset of this tile

    @pl.when(k == 0)
    def _init():
        # a_tilde = I + A  =>  +1 to every rowsum and +1 to every diagonal entry.
        dsum_ref[...] = jnp.ones_like(dsum_ref)
        diag_ref[...] = jnp.ones_like(diag_ref)

    a = a_ref[...].astype(jnp.float32)        # (tm, tk) -- narrow dtype cast on-chip
    dsum_ref[...] += jnp.sum(a, axis=-1, keepdims=True)

    # Diagonal entries for rows [row0, row0+tm) live in columns [row0, row0+tm):
    # only column tiles overlapping that range do the masked reduce.
    @pl.when(jnp.logical_and(row0 < col0 + tk, col0 < row0 + tm))
    def _diag():
        rows = lax.broadcasted_iota(jnp.int32, (tm, tk), 0) + row0
        cols = lax.broadcasted_iota(jnp.int32, (tm, tk), 1) + col0
        diag_ref[...] += jnp.sum(jnp.where(rows == cols, a, 0.0),
                                 axis=-1, keepdims=True)

    @pl.when(k == nk - 1)
    def _finalize():
        # d^-0.5 * diag * d^-0.5 == diag / d : a single reciprocal (EUP slot).
        h = diag_ref[...] * pl.reciprocal(dsum_ref[...], approx=False)  # (tm, 1)
        x = x_ref[...]                                                  # native dtype -> MXU
        lin = jnp.dot(x, wt_ref[...], preferred_element_type=jnp.float32)
        lin = lin + b_ref[...]                                          # f32 epilogue
        o_ref[...] = (h * lin + x.astype(jnp.float32)).astype(o_ref.dtype)


def gcn_res_block(x, a, weight, bias, *, tm=256, tk=512, vmem_limit_bytes=None):
    """out = h * (x @ weight.T + bias) + x with h[i] = (1+A[i,i])/(1+rowsum(A)[i])."""
    n, din = x.shape
    dout = weight.shape[0]
    assert weight.shape == (dout, din)
    assert din == dout, "residual requires in_dim == out_dim"
    assert a.shape == (n, n)

    tm = min(tm, n)
    tk = min(tk, n)
    assert n % tm == 0 and n % tk == 0, "node count must be a multiple of both tiles"
    assert tm == n or tm % 8 == 0
    assert tk == n or tk % 128 == 0

    # MXU operands in x's dtype (native bf16 path when x is bf16); f32 epilogue bias.
    wt = jnp.transpose(weight).astype(x.dtype)                # (din, dout)
    b = bias.astype(jnp.float32).reshape(1, dout)

    grid = (n // tm, n // tk)                                 # rows parallel, k (reduction) last

    # TODO(synk): for din/dout >~ 2048 tile the matmul over K/N grid axes (and/or
    # carry W in bf16 / pipeline_mode=pl.Buffered(1)) instead of a fully resident
    # (din, dout) weight block, to stay inside v7x's 64 MiB VMEM.
    return pl.pallas_call(
        gcn_res_fused_kernel,
        out_shape=jax.ShapeDtypeStruct((n, dout), x.dtype),
        grid=grid,
        in_specs=[
            pl.BlockSpec((tm, tk), lambda i, k: (i, k)),      # A, column-tiled stream
            pl.BlockSpec((tm, din), lambda i, k: (i, 0)),     # x   (invariant across k)
            pl.BlockSpec((din, dout), lambda i, k: (0, 0)),   # W.T (resident)
            pl.BlockSpec((1, dout), lambda i, k: (0, 0)),     # bias (resident)
        ],
        out_specs=pl.BlockSpec((tm, dout), lambda i, k: (i, 0)),
        scratch_shapes=[pltpu.VMEM((tm, 1), jnp.float32),     # rowsum(I + A) accumulator
                        pltpu.VMEM((tm, 1), jnp.float32)],    # diag(I + A) accumulator
        compiler_params=pltpu.CompilerParams(
            dimension_semantics=("parallel", "arbitrary"),    # v7x: row tiles shard across TCs
            vmem_limit_bytes=vmem_limit_bytes,
        ),
    )(a, x, wt, b)


if __name__ == "__main__":
    N = 64     # graph nodes
    DIM = 32   # in_dim == out_dim (residual block)

    key = jax.random.PRNGKey(0)
    kx, ka, kw, kb = jax.random.split(key, 4)

    # node features
    x = jax.random.normal(kx, (N, DIM), dtype=jnp.float32)

    # symmetric 0/1 adjacency with zero diagonal, stored narrow (bf16): the
    # kernel reads A in its storage dtype and casts to f32 on-chip, halving the
    # HBM traffic of the dominant (mem-bound) pass.
    a_rand = jax.random.uniform(ka, (N, N))
    a = jnp.triu((a_rand > 0.5).astype(jnp.float32), k=1)
    a = (a + a.T).astype(jnp.bfloat16)

    # nn.Linear(in_dim, out_dim) init: U(-1/sqrt(in_dim), 1/sqrt(in_dim))
    bound = 1.0 / jnp.sqrt(jnp.float32(DIM))
    weight = jax.random.uniform(kw, (DIM, DIM), minval=-bound, maxval=bound,
                                dtype=jnp.float32)
    bias = jax.random.uniform(kb, (DIM,), minval=-bound, maxval=bound,
                              dtype=jnp.float32)

    out = gcn_res_block(x, a, weight, bias)
    out = jax.block_until_ready(out)

    # pure-JAX reference with the original d^-0.5 * diag * d^-0.5 formulation
    a32 = a.astype(jnp.float32)
    eye = jnp.eye(N, dtype=jnp.float32)
    a_tilde = eye + a32
    d = a_tilde.sum(-1, keepdims=True)
    h_ref = (d ** -0.5) * jnp.diag(a_tilde)[:, None] * (d ** -0.5)
    ref = h_ref * (x @ weight.T + bias[None, :]) + x

    assert out.shape == (N, DIM)
    assert jnp.allclose(out, ref, atol=1e-5, rtol=1e-5), "mismatch vs reference"

    print("KERNEL_OK")
</pallas_src>

<mosaic_0001>
module attributes {stable_mosaic.version = 11 : i64} {
  func.func @gcn_res_fused_kernel(%arg0: i32, %arg1: i32, %arg2: memref<64x64xbf16, #tpu.memory_space<vmem>>, %arg3: memref<64x32xf32, #tpu.memory_space<vmem>>, %arg4: memref<32x32xf32, #tpu.memory_space<vmem>>, %arg5: memref<1x32xf32, #tpu.memory_space<vmem>>, %arg6: memref<64x32xf32, #tpu.memory_space<vmem>>, %arg7: memref<64x1xf32, #tpu.memory_space<vmem>>, %arg8: memref<64x1xf32, #tpu.memory_space<vmem>>) attributes {dimension_semantics = [#tpu.dimension_semantics<parallel>, #tpu.dimension_semantics<arbitrary>], iteration_bounds = array<i64: 1, 1>, scalar_prefetch = 0 : i64, scratch_operands = 2 : i64, tpu.core_type = #tpu.core_type<tc>, window_params = [{transform_indices = @transform_0, window_bounds = array<i64: 64, 64>}, {transform_indices = @transform_1, window_bounds = array<i64: 64, 32>}, {pipeline_mode = #tpu.pipeline_mode<synchronous>, transform_indices = @transform_2, window_bounds = array<i64: 32, 32>}, {pipeline_mode = #tpu.pipeline_mode<synchronous>, transform_indices = @transform_3, window_bounds = array<i64: 1, 32>}, {transform_indices = @transform_4, window_bounds = array<i64: 64, 32>}]} {
    %c64_i32 = arith.constant 64 : i32
    %0 = arith.muli %arg0, %c64_i32 : i32
    %c64_i32_0 = arith.constant 64 : i32
    %1 = arith.muli %arg1, %c64_i32_0 : i32
    %c0_i32 = arith.constant 0 : i32
    %2 = arith.cmpi eq, %arg1, %c0_i32 : i32
    %3 = arith.extui %2 : i1 to i32
    %c0_i32_1 = arith.constant 0 : i32
    %4 = arith.cmpi ne, %3, %c0_i32_1 : i32
    scf.if %4 {
      %cst_12 = arith.constant 1.000000e+00 : f32
      %22 = vector.broadcast %cst_12 : f32 to vector<64x1xf32>
      %c0_13 = arith.constant 0 : index
      %c0_14 = arith.constant 0 : index
      %23 = vector.load %arg7[%c0_13, %c0_14] : memref<64x1xf32, #tpu.memory_space<vmem>>, vector<64x1xf32>
      tpu.vector_store %arg7[%c0_13, %c0_14], %22 {strides = array<i32>} : memref<64x1xf32, #tpu.memory_space<vmem>>, vector<64x1xf32>,
      %cst_15 = arith.constant 1.000000e+00 : f32
      %24 = vector.broadcast %cst_15 : f32 to vector<64x1xf32>
      %c0_16 = arith.constant 0 : index
      %c0_17 = arith.constant 0 : index
      %25 = vector.load %arg8[%c0_16, %c0_17] : memref<64x1xf32, #tpu.memory_space<vmem>>, vector<64x1xf32>
      tpu.vector_store %arg8[%c0_16, %c0_17], %24 {strides = array<i32>} : memref<64x1xf32, #tpu.memory_space<vmem>>, vector<64x1xf32>,
    } else {
    }
    %c0 = arith.constant 0 : index
    %c0_2 = arith.constant 0 : index
    %5 = vector.load %arg2[%c0, %c0_2] : memref<64x64xbf16, #tpu.memory_space<vmem>>, vector<64x64xbf16>
    %6 = arith.extf %5 : vector<64x64xbf16> to vector<64x64xf32>
    %c0_3 = arith.constant 0 : index
    %c0_4 = arith.constant 0 : index
    %7 = vector.load %arg7[%c0_3, %c0_4] : memref<64x1xf32, #tpu.memory_space<vmem>>, vector<64x1xf32>
    %cst = arith.constant dense<0.000000e+00> : vector<64xf32>
    %8 = vector.multi_reduction <add>, %6, %cst [1] : vector<64x64xf32> to vector<64xf32>
    %9 = vector.shape_cast %8 : vector<64xf32> to vector<64x1xf32>
    %10 = arith.addf %7, %9 : vector<64x1xf32>
    %c0_5 = arith.constant 0 : index
    %c0_6 = arith.constant 0 : index
    %11 = vector.load %arg7[%c0_5, %c0_6] : memref<64x1xf32, #tpu.memory_space<vmem>>, vector<64x1xf32>
    tpu.vector_store %arg7[%c0_5, %c0_6], %10 {strides = array<i32>} : memref<64x1xf32, #tpu.memory_space<vmem>>, vector<64x1xf32>,
    %c64_i32_7 = arith.constant 64 : i32
    %12 = arith.addi %1, %c64_i32_7 : i32
    %13 = arith.cmpi slt, %0, %12 : i32
    %c64_i32_8 = arith.constant 64 : i32
    %14 = arith.addi %0, %c64_i32_8 : i32
    %15 = arith.cmpi slt, %1, %14 : i32
    %16 = arith.andi %13, %15 : i1
    %17 = arith.extui %16 : i1 to i32
    %c0_i32_9 = arith.constant 0 : i32
    %18 = arith.cmpi ne, %17, %c0_i32_9 : i32
    scf.if %18 {
      %22 = tpu.iota {dimensions = array<i32: 0>} : vector<64x64xi32>
      %23 = vector.broadcast %0 : i32 to vector<64x64xi32>
      %24 = arith.addi %22, %23 : vector<64x64xi32>
      %25 = tpu.iota {dimensions = array<i32: 1>} : vector<64x64xi32>
      %26 = vector.broadcast %1 : i32 to vector<64x64xi32>
      %27 = arith.addi %25, %26 : vector<64x64xi32>
      %c0_12 = arith.constant 0 : index
      %c0_13 = arith.constant 0 : index
      %28 = vector.load %arg8[%c0_12, %c0_13] : memref<64x1xf32, #tpu.memory_space<vmem>>, vector<64x1xf32>
      %29 = arith.cmpi eq, %24, %27 : vector<64x64xi32>
      %cst_14 = arith.constant 0.000000e+00 : f32
      %30 = vector.broadcast %cst_14 : f32 to vector<64x64xf32>
      %31 = arith.select %29, %6, %30 : vector<64x64xi1>, vector<64x64xf32>
      %cst_15 = arith.constant dense<0.000000e+00> : vector<64xf32>
      %32 = vector.multi_reduction <add>, %31, %cst_15 [1] : vector<64x64xf32> to vector<64xf32>
      %33 = vector.shape_cast %32 : vector<64xf32> to vector<64x1xf32>
      %34 = arith.addf %28, %33 : vector<64x1xf32>
      %c0_16 = arith.constant 0 : index
      %c0_17 = arith.constant 0 : index
      %35 = vector.load %arg8[%c0_16, %c0_17] : memref<64x1xf32, #tpu.memory_space<vmem>>, vector<64x1xf32>
      tpu.vector_store %arg8[%c0_16, %c0_17], %34 {strides = array<i32>} : memref<64x1xf32, #tpu.memory_space<vmem>>, vector<64x1xf32>,
    } else {
    }
    %c0_i32_10 = arith.constant 0 : i32
    %19 = arith.cmpi eq, %arg1, %c0_i32_10 : i32
    %20 = arith.extui %19 : i1 to i32
    %c0_i32_11 = arith.constant 0 : i32
    %21 = arith.cmpi ne, %20, %c0_i32_11 : i32
    scf.if %21 {
      %c0_12 = arith.constant 0 : index
      %c0_13 = arith.constant 0 : index
      %22 = vector.load %arg8[%c0_12, %c0_13] : memref<64x1xf32, #tpu.memory_space<vmem>>, vector<64x1xf32>
      %c0_14 = arith.constant 0 : index
      %c0_15 = arith.constant 0 : index
      %23 = vector.load %arg7[%c0_14, %c0_15] : memref<64x1xf32, #tpu.memory_space<vmem>>, vector<64x1xf32>
      %24 = tpu.reciprocal %23 : vector<64x1xf32> -> vector<64x1xf32>
      %25 = arith.mulf %22, %24 : vector<64x1xf32>
      %c0_16 = arith.constant 0 : index
      %c0_17 = arith.constant 0 : index
      %26 = vector.load %arg3[%c0_16, %c0_17] : memref<64x32xf32, #tpu.memory_space<vmem>>, vector<64x32xf32>
      %c0_18 = arith.constant 0 : index
      %c0_19 = arith.constant 0 : index
      %27 = vector.load %arg4[%c0_18, %c0_19] : memref<32x32xf32, #tpu.memory_space<vmem>>, vector<32x32xf32>
      %cst_20 = arith.constant dense<0.000000e+00> : vector<64x32xf32>
      %28 = tpu.matmul %26, %27, %cst_20 {dimension_numbers = #tpu.dot_dimension_numbers<[1], [0], [0], [1], [0, 0, 1, 1], [], []>} : vector<64x32xf32>, vector<32x32xf32>, vector<64x32xf32> -> vector<64x32xf32>
      %c0_21 = arith.constant 0 : index
      %c0_22 = arith.constant 0 : index
      %29 = vector.load %arg5[%c0_21, %c0_22] : memref<1x32xf32, #tpu.memory_space<vmem>>, vector<1x32xf32>
      %30 = vector.broadcast %29 : vector<1x32xf32> to vector<64x32xf32>
      %31 = arith.addf %28, %30 : vector<64x32xf32>
      %32 = vector.broadcast %25 : vector<64x1xf32> to vector<64x32xf32>
      %33 = arith.mulf %32, %31 : vector<64x32xf32>
      %34 = arith.addf %33, %26 : vector<64x32xf32>
      %c0_23 = arith.constant 0 : index
      %c0_24 = arith.constant 0 : index
      %35 = vector.load %arg6[%c0_23, %c0_24] : memref<64x32xf32, #tpu.memory_space<vmem>>, vector<64x32xf32>
      tpu.vector_store %arg6[%c0_23, %c0_24], %34 {strides = array<i32>} : memref<64x32xf32, #tpu.memory_space<vmem>>, vector<64x32xf32>,
    } else {
    }
    return
  }
  func.func @transform_0(%arg0: i32, %arg1: i32) -> (i32, i32) {
    %c0_i32 = arith.constant 0 : i32
    return %arg0, %arg1 : i32, i32
  }
  func.func @transform_1(%arg0: i32, %arg1: i32) -> (i32, i32) {
    %c0_i32 = arith.constant 0 : i32
    %c0_i32_0 = arith.constant 0 : i32
    return %arg0, %c0_i32 : i32, i32
  }
  func.func @transform_2(%arg0: i32, %arg1: i32) -> (i32, i32) {
    %c0_i32 = arith.constant 0 : i32
    %c0_i32_0 = arith.constant 0 : i32
    %c0_i32_1 = arith.constant 0 : i32
    return %c0_i32, %c0_i32_0 : i32, i32
  }
  func.func @transform_3(%arg0: i32, %arg1: i32) -> (i32, i32) {
    %c0_i32 = arith.constant 0 : i32
    %c0_i32_0 = arith.constant 0 : i32
    %c0_i32_1 = arith.constant 0 : i32
    return %c0_i32, %c0_i32_0 : i32, i32
  }
  func.func @transform_4(%arg0: i32, %arg1: i32) -> (i32, i32) {
    %c0_i32 = arith.constant 0 : i32
    %c0_i32_0 = arith.constant 0 : i32
    return %arg0, %c0_i32 : i32, i32
  }
}

</mosaic_0001>

<bundles_post_ra>
// kernel: tpu_custom_call.1
= control target key start
LH: loop header
LB: loop body
LE: loop exit
PB: predicated region body
PF: predicated region fallthrough
CT: control target
= control target key end

     0   :  { %vm23_vm0 = vcmask 7168   ;;  %vm64_vm1 = vcmask 523264   ;;  %v114_v2 = vlaneseq  ;;  %vm254_vm2 = vcmask 261120   ;;  %s788_s0 = inlined_call_operand.vmem [shape: bf16[64,64], index: 0, kind: input, shape index: {}]   ;;  %s789_s2 = inlined_call_operand.vmem [shape: f32[32,32], index: 2, kind: input, shape index: {}]   ;;  %s790_s1 = inlined_call_operand.vmem [shape: f32[64,32], index: 1, kind: input, shape index: {}]   ;;  %s791_s3 = inlined_call_operand.vmem [shape: f32[1,32], index: 3, kind: input, shape index: {}]   ;;  %s792_s4 = inlined_call_operand.vmem [shape: f32[64,32], index: 4, kind: output, shape index: {}]  }
   0x1   :  { %v570_v0 = vld [vmem:[%s788_s0 + $0x8] sm:$0xff]   ;;  %v575_v1 = vld [vmem:[%s788_s0] sm:$0xff]   ;;  %v584_v7 = vld [vmem:[%s788_s0 + $0x10] sm:$0xff]   ;;  %v540_v9 = vmov 1.0   ;;  %v541_v59 = vmov 0  }
   0x2   :  { %v467_v3 = vunpack.c.l.bf16 %v570_v0  ;;  %v463_v4 = vunpack.c.l.bf16 %v575_v1  ;;  %v468_v5 = vunpack.c.h.bf16 %v570_v0  ;;  %v464_v6 = vunpack.c.h.bf16 %v575_v1  ;;  %v246_v8 = vld [vmem:[%s789_s2 + $0x18] sm:$0xff]  ;;  %26 = vst.msk [vmem:[#allocation2 + $0x10] sm:$0xff] %vm23_vm0, %v540_v9  ;;  %24 = vst.msk [vmem:[#allocation2] sm:$0xff] %vm23_vm0, %v540_v9  ;;  %v245_v10 = vld [vmem:[%s789_s2 + $0x10] sm:$0xff]  ;;  %522 = vset.pattern.permute.xlu0 %v541_v59  ;;  %523 = vset.pattern.permute.xlu1 %v541_v59 }
   0x3   :  { %25 = vst.msk [vmem:[#allocation2 + $0x8] sm:$0xff] %vm23_vm0, %v540_v9  ;;  %27 = vst.msk [vmem:[#allocation2 + $0x18] sm:$0xff] %vm23_vm0, %v540_v9  ;;  %492 = vmatprep.subr.mxu0 %v246_v8  ;;  %v611_v11 = vld [vmem:[%s790_s1] sm:$0xff]  ;;  %512 = vmatprep.subr.mxu1 %v246_v8  ;;  %v472_v14 = vunpack.c.h.bf16 %v584_v7  ;;  %v244_v15 = vld [vmem:[%s789_s2 + $0x8] sm:$0xff]  ;;  %v471_v18 = vunpack.c.l.bf16 %v584_v7  ;;  %v115_v19 = vshrl.u32 %v114_v2, 7  ;;  %v637_v22 = vand.u32 127, %v114_v2 }
   0x4   :  { %28 = vst.msk [vmem:[#allocation2 + $0x20] sm:$0xff] %vm23_vm0, %v540_v9  ;;  %29 = vst.msk [vmem:[#allocation2 + $0x28] sm:$0xff] %vm23_vm0, %v540_v9  ;;  %v71_v12 = vsel %vm64_vm1, %v467_v3, 0.0  ;;  %v65_v13 = vsel %vm64_vm1, %v463_v4, 0.0  ;;  %493 = vmatpush3.msra.mxu0 %v246_v8  ;;  %500 = vmatprep.mubr.msk.f32.mxu0 %vm254_vm2, %v611_v11  ;;  %v74_v16 = vsel %vm64_vm1, %v468_v5, 0.0  ;;  %v68_v17 = vsel %vm64_vm1, %v464_v6, 0.0 }
   0x5   :  { %30 = vst.msk [vmem:[#allocation2 + $0x30] sm:$0xff] %vm23_vm0, %v540_v9  ;;  %31 = vst.msk [vmem:[#allocation2 + $0x38] sm:$0xff] %vm23_vm0, %v540_v9  ;;  %72 = vadd.xlane.f32.xlu1 %v71_v12  ;;  %66 = vadd.xlane.f32.xlu0 %v65_v13  ;;  %v635_v20 = vld [vmem:[%s788_s0 + $0x18] sm:$0xff]   ;;  %v116_v21 = vadd.s32 8, %v115_v19  ;;  %v243_v23 = vld [vmem:[%s789_s2] sm:$0xff]  ;;  %v80_v24 = vsel %vm64_vm1, %v472_v14, 0.0  ;;  %vm144_vm4 = vcmp.eq.s32.totalorder %v115_v19, %v637_v22 }
   0x6   :  { %32 = vst.msk [vmem:[#allocation3] sm:$0xff] %vm23_vm0, %v540_v9  ;;  %33 = vst.msk [vmem:[#allocation3 + $0x8] sm:$0xff] %vm23_vm0, %v540_v9  ;;  %494 = vmatprep.subr.mxu0 %v245_v10  ;;  %516 = vmatpush3.msra.mxu1 %v246_v8  ;;  %v77_v25 = vsel %vm64_vm1, %v471_v18, 0.0  ;;  %v476_v26 = vunpack.c.h.bf16 %v635_v20  ;;  %v475_v27 = vunpack.c.l.bf16 %v635_v20  ;;  %v653_v28 = vld [vmem:[%s790_s1 + $0x8] sm:$0xff]  ;;  %v118_v29 = vadd.s32 24, %v115_v19  ;;  %v660_v31 = vld [vmem:[%s790_s1 + $0x10] sm:$0xff] }
   0x7   :  { %34 = vst.msk [vmem:[#allocation3 + $0x10] sm:$0xff] %vm23_vm0, %v540_v9  ;;  %35 = vst.msk [vmem:[#allocation3 + $0x18] sm:$0xff] %vm23_vm0, %v540_v9  ;;  %495 = vmatpush3.msra.mxu0 %v245_v10  ;;  %513 = vmatprep.subr.mxu1 %v245_v10  ;;  %vm145_vm3 = vcmp.eq.s32.totalorder %v116_v21, %v637_v22  ;;  %v117_v30 = vadd.s32 16, %v115_v19  ;;  %v665_v32 = vld [vmem:[%s790_s1 + $0x20] sm:$0xff]  ;;  %v670_v33 = vld [vmem:[%s790_s1 + $0x28] sm:$0xff]  ;;  %v152_v37 = vsel %vm144_vm4, %v463_v4, 0.0 }
   0x8   :  { %36 = vst.msk [vmem:[#allocation3 + $0x20] sm:$0xff] %vm23_vm0, %v540_v9  ;;  %37 = vst.msk [vmem:[#allocation3 + $0x28] sm:$0xff] %vm23_vm0, %v540_v9  ;;  %496 = vmatprep.subr.mxu0 %v244_v15  ;;  %517 = vmatpush3.msra.mxu1 %v245_v10  ;;  %v86_v34 = vsel %vm64_vm1, %v476_v26, 0.0  ;;  %v83_v35 = vsel %vm64_vm1, %v475_v27, 0.0  ;;  %v153_v36 = vsel %vm145_vm3, %v464_v6, 0.0  ;;  %v685_v38 = vld [vmem:[%s790_s1 + $0x18] sm:$0xff]  ;;  %vm147_vm5 = vcmp.eq.s32.totalorder %v118_v29, %v637_v22 }
   0x9   :  { %38 = vst.msk [vmem:[#allocation3 + $0x30] sm:$0xff] %vm23_vm0, %v540_v9  ;;  %39 = vst.msk [vmem:[#allocation3 + $0x38] sm:$0xff] %vm23_vm0, %v540_v9  ;;  %75 = vadd.xlane.f32.xlu1 %v74_v16  ;;  %69 = vadd.xlane.f32.xlu0 %v68_v17  ;;  %v692_v39 = vld [vmem:[%s790_s1 + $0x30] sm:$0xff]  ;;  %vm146_vm6 = vcmp.eq.s32.totalorder %v117_v30, %v637_v22  ;;  %v120_v40 = vadd.s32 40, %v115_v19  ;;  %v119_v41 = vadd.s32 32, %v115_v19  ;;  %v701_v42 = vld [vmem:[%s790_s1 + $0x38] sm:$0xff] }
   0xa   :  { %497 = vmatpush3.msra.mxu0 %v244_v15  ;;  %514 = vmatprep.subr.mxu1 %v244_v15  ;;  %v163_v43 = vsel %vm64_vm1, %v153_v36, 0.0  ;;  %v160_v44 = vsel %vm64_vm1, %v152_v37, 0.0  ;;  %v155_v45 = vsel %vm147_vm5, %v468_v5, 0.0  ;;  %v154_v46 = vsel %vm146_vm6, %v467_v3, 0.0  ;;  %v58_v60 = vld [vmem:[#allocation2 + $0x10] sm:$0xff]  ;;  %v56_v61 = vld [vmem:[#allocation2] sm:$0xff] }
   0xb   :  { %498 = vmatprep.subr.mxu0 %v243_v23  ;;  %518 = vmatpush3.msra.mxu1 %v244_v15  ;;  %vm149_vm7 = vcmp.eq.s32.totalorder %v120_v40, %v637_v22  ;;  %vm148_vm8 = vcmp.eq.s32.totalorder %v119_v41, %v637_v22  ;;  %v122_v47 = vadd.s32 56, %v115_v19  ;;  %v121_v48 = vadd.s32 48, %v115_v19  ;;  %v59_v2 = vld [vmem:[#allocation2 + $0x18] sm:$0xff]  ;;  %v57_v3 = vld [vmem:[#allocation2 + $0x8] sm:$0xff]  ;;  %v60_v9 = vld [vmem:[#allocation2 + $0x20] sm:$0xff] }
   0xc   :  { %499 = vmatpush3.msra.mxu0 %v243_v23  ;;  %515 = vmatprep.subr.mxu1 %v243_v23  ;;  %v169_v49 = vsel %vm64_vm1, %v155_v45, 0.0  ;;  %v166_v50 = vsel %vm64_vm1, %v154_v46, 0.0  ;;  %v157_v51 = vsel %vm149_vm7, %v472_v14, 0.0  ;;  %v156_v52 = vsel %vm148_vm8, %v471_v18, 0.0  ;;  %v61_v8 = vld [vmem:[#allocation2 + $0x28] sm:$0xff]  ;;  %v63_v15 = vld [vmem:[#allocation2 + $0x38] sm:$0xff] }
   0xd   :  { %81 = vadd.xlane.f32.xlu1 %v80_v24  ;;  %78 = vadd.xlane.f32.xlu0 %v77_v25  ;;  %vm151_vm9 = vcmp.eq.s32.totalorder %v122_v47, %v637_v22  ;;  %vm150_vm10 = vcmp.eq.s32.totalorder %v121_v48, %v637_v22  ;;  %v175_v53 = vsel %vm64_vm1, %v157_v51, 0.0  ;;  %v172_v54 = vsel %vm64_vm1, %v156_v52, 0.0  ;;  %v62_v16 = vld [vmem:[#allocation2 + $0x30] sm:$0xff]  ;;  %v137_v22 = vld [vmem:[#allocation3 + $0x8] sm:$0xff] }
   0xe   :  { %501 = vmatmul.mubr.msk.f32.vlgmr.msra.gmra.mxu0 %vm254_vm2, %v653_v28  ;;  %519 = vmatpush3.msra.mxu1 %v243_v23  ;;  %v159_v55 = vsel %vm151_vm9, %v476_v26, 0.0  ;;  %v158_v56 = vsel %vm150_vm10, %v475_v27, 0.0  ;;  %v136_v23 = vld [vmem:[#allocation3] sm:$0xff] }
   0xf   :  { %503 = vmatprep.mubr.msk.f32.mxu0 %vm254_vm2, %v660_v31  ;;  %506 = vmatprep.mubr.msk.f32.mxu1 %vm254_vm2, %v665_v32  ;;  %v181_v57 = vsel %vm64_vm1, %v159_v55, 0.0  ;;  %v178_v58 = vsel %vm64_vm1, %v158_v56, 0.0  ;;  %v140_v45 = vld [vmem:[#allocation3 + $0x20] sm:$0xff] }
  0x10   :  { %507 = vmatmul.mubr.msk.f32.vlgmr.msra.gmra.mxu1 %vm254_vm2, %v670_v33  ;;  %v143_v51 = vld [vmem:[#allocation3 + $0x38] sm:$0xff]  ;;  %v142_v52 = vld [vmem:[#allocation3 + $0x30] sm:$0xff] }
  0x11   :  { %87 = vadd.xlane.f32.xlu1 %v86_v34  ;;  %84 = vadd.xlane.f32.xlu0 %v83_v35  ;;  %v139_v34 = vld [vmem:[#allocation3 + $0x18] sm:$0xff]  ;;  %v138_v35 = vld [vmem:[#allocation3 + $0x10] sm:$0xff] }
  0x12   :  { %504 = vmatmul.mubr.msk.f32.gmra.mxu0 %vm254_vm2, %v685_v38  ;;  %509 = vmatprep.mubr.msk.f32.mxu1 %vm254_vm2, %v692_v39 }
  0x14   :  { %510 = vmatmul.mubr.msk.f32.gmra.mxu1 %vm254_vm2, %v701_v42 }
  0x15   :  { %164 = vadd.xlane.f32.xlu1 %v163_v43  ;;  %161 = vadd.xlane.f32.xlu0 %v160_v44  ;;  %v141_v44 = vld [vmem:[#allocation3 + $0x28] sm:$0xff] }
  0x19   :  { %170 = vadd.xlane.f32.xlu1 %v169_v49  ;;  %167 = vadd.xlane.f32.xlu0 %v166_v50 }
  0x1d   :  { %176 = vadd.xlane.f32.xlu1 %v175_v53  ;;  %173 = vadd.xlane.f32.xlu0 %v172_v54 }
  0x21   :  { %182 = vadd.xlane.f32.xlu1 %v181_v57  ;;  %179 = vadd.xlane.f32.xlu0 %v178_v58 }
  0x8e   :  { %v73_v62 = vpop.xlane.xlu1 %72  ;;  %v67_v63 = vpop.xlane.xlu0 %66 }
  0x8f   :  { %v91_v0 = vadd.f32 %v73_v62, %v58_v60  ;;  %v89_v1 = vadd.f32 %v67_v63, %v56_v61 }
  0x91   :  { %100 = vst.msk [vmem:[#allocation2 + $0x10] sm:$0xff] %vm23_vm0, %v91_v0  ;;  %98 = vst.msk [vmem:[#allocation2] sm:$0xff] %vm23_vm0, %v89_v1 }
  0x92   :  { %v76_v4 = vpop.xlane.xlu1 %75  ;;  %v70_v5 = vpop.xlane.xlu0 %69 }
  0x93   :  { %v92_v6 = vadd.f32 %v76_v4, %v59_v2  ;;  %v90_v7 = vadd.f32 %v70_v5, %v57_v3 }
  0x95   :  { %101 = vst.msk [vmem:[#allocation2 + $0x18] sm:$0xff] %vm23_vm0, %v92_v6  ;;  %99 = vst.msk [vmem:[#allocation2 + $0x8] sm:$0xff] %vm23_vm0, %v90_v7 }
  0x96   :  { %v82_v10 = vpop.xlane.xlu1 %81  ;;  %v79_v12 = vpop.xlane.xlu0 %78 }
  0x97   :  { %v94_v13 = vadd.f32 %v82_v10, %v61_v8  ;;  %v93_v14 = vadd.f32 %v79_v12, %v60_v9 }
  0x98   :  { %v211_v17 = vld [vmem:[#allocation2] sm:$0xff]  ;;  %v213_v27 = vld [vmem:[#allocation2 + $0x10] sm:$0xff] }
  0x99   :  { %103 = vst.msk [vmem:[#allocation2 + $0x28] sm:$0xff] %vm23_vm0, %v94_v13  ;;  %102 = vst.msk [vmem:[#allocation2 + $0x20] sm:$0xff] %vm23_vm0, %v93_v14  ;;  %524 = vrcp.f32 %v211_v17 }
  0x9a   :  { %v88_v18 = vpop.xlane.xlu1 %87  ;;  %v85_v19 = vpop.xlane.xlu0 %84 }
  0x9b   :  { %v96_v20 = vadd.f32 %v88_v18, %v63_v15  ;;  %v95_v21 = vadd.f32 %v85_v19, %v62_v16 }
  0x9c   :  { %v212_v24 = vld [vmem:[#allocation2 + $0x8] sm:$0xff]  ;;  %v214_v36 = vld [vmem:[#allocation2 + $0x18] sm:$0xff] }
  0x9d   :  { %105 = vst.msk [vmem:[#allocation2 + $0x38] sm:$0xff] %vm23_vm0, %v96_v20  ;;  %104 = vst.msk [vmem:[#allocation2 + $0x30] sm:$0xff] %vm23_vm0, %v95_v21  ;;  %526 = vrcp.f32 %v212_v24 }
  0x9e   :  { %v165_v25 = vpop.xlane.xlu1 %164  ;;  %v162_v26 = vpop.xlane.xlu0 %161  ;;  %528 = vrcp.f32 %v213_v27 }
  0x9f   :  { %v185_v29 = vadd.f32 %v165_v25, %v137_v22  ;;  %v184_v30 = vadd.f32 %v162_v26, %v136_v23  ;;  %530 = vrcp.f32 %v214_v36  ;;  %v452_v22 = vld [vmem:[%s791_s3] ss:$0 sm:$0xff] }
  0xa0   :  { %v215_v46 = vld [vmem:[#allocation2 + $0x20] sm:$0xff]  ;;  %v216_v56 = vld [vmem:[#allocation2 + $0x28] sm:$0xff] }
  0xa1   :  { %193 = vst.msk [vmem:[#allocation3 + $0x8] sm:$0xff] %vm23_vm0, %v185_v29  ;;  %192 = vst.msk [vmem:[#allocation3] sm:$0xff] %vm23_vm0, %v184_v30  ;;  %532 = vrcp.f32 %v215_v46 }
  0xa2   :  { %v171_v37 = vpop.xlane.xlu1 %170  ;;  %v168_v40 = vpop.xlane.xlu0 %167  ;;  %534 = vrcp.f32 %v216_v56 }
  0xa3   :  { %v187_v41 = vadd.f32 %v171_v37, %v139_v34  ;;  %v186_v43 = vadd.f32 %v168_v40, %v138_v35 }
  0xa4   :  { %v217_v1 = vld [vmem:[#allocation2 + $0x30] sm:$0xff]  ;;  %v218_v6 = vld [vmem:[#allocation2 + $0x38] sm:$0xff] }
  0xa5   :  { %195 = vst.msk [vmem:[#allocation3 + $0x18] sm:$0xff] %vm23_vm0, %v187_v41  ;;  %194 = vst.msk [vmem:[#allocation3 + $0x10] sm:$0xff] %vm23_vm0, %v186_v43  ;;  %536 = vrcp.f32 %v217_v1 }
  0xa6   :  { %v177_v47 = vpop.xlane.xlu1 %176  ;;  %v174_v48 = vpop.xlane.xlu0 %173  ;;  %538 = vrcp.f32 %v218_v6 }
  0xa7   :  { %v189_v49 = vadd.f32 %v177_v47, %v141_v44  ;;  %v188_v50 = vadd.f32 %v174_v48, %v140_v45  ;;  %v525_v53 = vpop.eup %524 }
  0xa8   :  { %v203_v54 = vld [vmem:[#allocation3] sm:$0xff]  ;;  %v204_v55 = vld [vmem:[#allocation3 + $0x8] sm:$0xff] }
  0xa9   :  { %197 = vst.msk [vmem:[#allocation3 + $0x28] sm:$0xff] %vm23_vm0, %v189_v49  ;;  %196 = vst.msk [vmem:[#allocation3 + $0x20] sm:$0xff] %vm23_vm0, %v188_v50  ;;  %v227_v57 = vmul.f32 %v525_v53, %v203_v54 }
  0xaa   :  { %v527_v58 = vpop.eup %526  ;;  %v183_v59 = vpop.xlane.xlu1 %182 }
  0xab   :  { %v180_v60 = vpop.xlane.xlu0 %179  ;;  %v191_v61 = vadd.f32 %v183_v59, %v143_v51  ;;  %386 = vperm.xlu0 %522, %v227_v57   ;;  %v228_v63 = vmul.f32 %v527_v58, %v204_v55  ;;  %v529_v2 = vpop.eup %528 }
  0xac   :  { %v190_v62 = vadd.f32 %v180_v60, %v142_v52  ;;  %v205_v0 = vld [vmem:[#allocation3 + $0x10] sm:$0xff]  ;;  %v531_v4 = vpop.eup %530  ;;  %v206_v5 = vld [vmem:[#allocation3 + $0x18] sm:$0xff] }
  0xad   :  { %199 = vst.msk [vmem:[#allocation3 + $0x38] sm:$0xff] %vm23_vm0, %v191_v61  ;;  %391 = vperm.xlu1 %523, %v228_v63   ;;  %v229_v3 = vmul.f32 %v529_v2, %v205_v0  ;;  %v230_v7 = vmul.f32 %v531_v4, %v206_v5 }
  0xae   :  { %198 = vst.msk [vmem:[#allocation3 + $0x30] sm:$0xff] %vm23_vm0, %v190_v62  ;;  %v533_v8 = vpop.eup %532 }
  0xaf   :  { %v535_v12 = vpop.eup %534 }
  0xb0   :  { %v207_v9 = vld [vmem:[#allocation3 + $0x20] sm:$0xff]  ;;  %v208_v13 = vld [vmem:[#allocation3 + $0x28] sm:$0xff] }
  0xb1   :  { %396 = vperm.xlu1 %523, %v229_v3   ;;  %v231_v10 = vmul.f32 %v533_v8, %v207_v9  ;;  %v232_v14 = vmul.f32 %v535_v12, %v208_v13 }
  0xb2   :  { %v537_v15 = vpop.eup %536 }
  0xb3   :  { %v539_v18 = vpop.eup %538 }
  0xb4   :  { %v210_v19 = vld [vmem:[#allocation3 + $0x38] sm:$0xff] }
  0xb5   :  { %401 = vperm.xlu1 %523, %v230_v7   ;;  %v209_v16 = vld [vmem:[#allocation3 + $0x30] sm:$0xff]  ;;  %v234_v20 = vmul.f32 %v539_v18, %v210_v19 }
  0xb6   :  { %v233_v17 = vmul.f32 %v537_v15, %v209_v16 }
  0xb9   :  { %406 = vperm.xlu1 %523, %v231_v10  }
  0xbd   :  { %411 = vperm.xlu1 %523, %v232_v14  }
  0xc1   :  { %416 = vperm.xlu1 %523, %v233_v17  }
  0xc5   :  { %421 = vperm.xlu1 %523, %v234_v20  }
  0xce   :  { %v502_v21 = vpop.f32.mrf.mxu0 }
  0xcf   :  { %v351_v26 = vadd.f32 %v502_v21, %v452_v22 }
  0xd0   :  { %v345_v23 = vpop.f32.mrf.mxu0  ;;  %v508_v40 = vpop.f32.mrf.mxu1 }
  0xd1   :  { %v346_v25 = vadd.f32 %v452_v22, %v345_v23  ;;  %v371_v52 = vadd.f32 %v508_v40, %v452_v22 }
  0xd2   :  { %v505_v24 = vpop.f32.mrf.mxu0  ;;  %v365_v46 = vpop.f32.mrf.mxu1 }
  0xd3   :  { %v361_v44 = vadd.f32 %v505_v24, %v452_v22  ;;  %v366_v49 = vadd.f32 %v452_v22, %v365_v46 }
  0xd4   :  { %v355_v29 = vpop.f32.mrf.mxu0 }
  0xd5   :  { %v356_v37 = vadd.f32 %v452_v22, %v355_v29 }
 0x126   :  { %v387_v27 = vpop.permute.xlu0 %386 }
 0x127   :  { %v424_v30 = vmul.f32 %v387_v27, %v346_v25 }
 0x128   :  { %v392_v34 = vpop.permute.xlu1 %391 }
 0x129   :  { %v432_v35 = vadd.f32 %v424_v30, %v611_v11  ;;  %v425_v36 = vmul.f32 %v392_v34, %v351_v26 }
 0x12b   :  { %440 = vst.msk [vmem:[%s792_s4] sm:$0xff] %vm254_vm2, %v432_v35  ;;  %v433_v41 = vadd.f32 %v425_v36, %v653_v28  ;;  %v511_v28 = vpop.f32.mrf.mxu1 }
 0x12c   :  { %v397_v43 = vpop.permute.xlu1 %396  ;;  %v381_v60 = vadd.f32 %v511_v28, %v452_v22 }
 0x12d   :  { %441 = vst.msk [vmem:[%s792_s4 + $0x8] sm:$0xff] %vm254_vm2, %v433_v41  ;;  %v426_v45 = vmul.f32 %v397_v43, %v356_v37 }
 0x12f   :  { %v434_v11 = vadd.f32 %v426_v45, %v660_v31  ;;  %v375_v31 = vpop.f32.mrf.mxu1 }
 0x130   :  { %v402_v47 = vpop.permute.xlu1 %401  ;;  %v376_v57 = vadd.f32 %v452_v22, %v375_v31 }
 0x131   :  { %442 = vst.msk [vmem:[%s792_s4 + $0x10] sm:$0xff] %vm254_vm2, %v434_v11  ;;  %v427_v48 = vmul.f32 %v402_v47, %v361_v44 }
 0x133   :  { %v435_v50 = vadd.f32 %v427_v48, %v685_v38 }
 0x134   :  { %v407_v51 = vpop.permute.xlu1 %406 }
 0x135   :  { %443 = vst.msk [vmem:[%s792_s4 + $0x18] sm:$0xff] %vm254_vm2, %v435_v50  ;;  %v428_v53 = vmul.f32 %v407_v51, %v366_v49 }
 0x137   :  { %v436_v54 = vadd.f32 %v428_v53, %v665_v32 }
 0x138   :  { %v412_v55 = vpop.permute.xlu1 %411 }
 0x139   :  { %444 = vst.msk [vmem:[%s792_s4 + $0x20] sm:$0xff] %vm254_vm2, %v436_v54  ;;  %v429_v56 = vmul.f32 %v412_v55, %v371_v52 }
 0x13b   :  { %v437_v38 = vadd.f32 %v429_v56, %v670_v33 }
 0x13c   :  { %v417_v58 = vpop.permute.xlu1 %416 }
 0x13d   :  { %445 = vst.msk [vmem:[%s792_s4 + $0x28] sm:$0xff] %vm254_vm2, %v437_v38  ;;  %v430_v59 = vmul.f32 %v417_v58, %v376_v57 }
 0x13f   :  { %v438_v32 = vadd.f32 %v430_v59, %v692_v39 }
 0x140   :  { %v422_v61 = vpop.permute.xlu1 %421 }
 0x141   :  { %446 = vst.msk [vmem:[%s792_s4 + $0x30] sm:$0xff] %vm254_vm2, %v438_v32  ;;  %v431_v62 = vmul.f32 %v422_v61, %v381_v60 }
 0x143   :  { %v439_v63 = vadd.f32 %v431_v62, %v701_v42 }
 0x145   :  { %447 = vst.msk [vmem:[%s792_s4 + $0x38] sm:$0xff] %vm254_vm2, %v439_v63 }

</bundles_post_ra>
